<compile_context>
chip_gen: v5e
topology: v5e:2x2
jax: 0.10.0
libtpu: 0.0.40
codegen_flags: <defaults>
</compile_context>

<pallas_src>
import jax
import jax.numpy as jnp
from jax.experimental import pallas as pl
from jax.experimental.pallas import tpu as pltpu


def _matching_norm_kernel(inv_sig_ref, mat_ref, mask_ref, out_ref):
    # inv_sig_ref: (1,) f32 in SMEM, holds 1 / sigmoid(tau) (precomputed).
    inv_sig = inv_sig_ref[0]

    valid = mask_ref[...] != 0                       # int8 -> bool, in-kernel
    # Fused: matrix*mask/sigmoid(tau) + (-1e9)*(~mask)  ==  where(mask, m/s, -1e9)
    x = jnp.where(valid, mat_ref[...] * inv_sig, -1.0e9)

    # softmax over axis=1 (the N axis of the (TB, N, MT) block)
    x_max = jnp.max(x, axis=1, keepdims=True)
    e = jnp.exp(x - x_max)
    denom = jnp.sum(e, axis=1, keepdims=True)
    out_ref[...] = e * pl.reciprocal(denom, approx=False)


def _choose_m_tile(N, M, itemsize, budget):
    """Tile M (lane axis) only when it can stay a multiple of 128."""
    if M % 128 != 0:
        return M  # full extent is always a legal block dim
    candidates = [m for m in range(128, M + 1, 128) if M % m == 0]
    fitting = [m for m in candidates if N * m * itemsize <= budget]
    return max(fitting) if fitting else min(candidates)


def _choose_b_tile(B, N, mt, itemsize, budget, m_steps):
    """Largest divisor of B fitting the budget, keeping >=2 grid steps if possible."""
    tb = 1
    for d in range(1, B + 1):
        if B % d == 0 and d * N * mt * itemsize <= budget:
            tb = d
    if m_steps * (B // tb) < 2:  # keep both v7x TensorCores busy when we can
        for d in range(tb, 0, -1):
            if B % d == 0 and m_steps * (B // d) >= 2:
                tb = d
                break
    return tb


def matching_matrix_normalization(matrix: jax.Array,
                                  mask: jax.Array,
                                  tau: jax.Array) -> jax.Array:
    """matrix: (B, N, M) float32; mask: (B, N, M) bool or int8; tau: (1,) float32."""
    B, N, M = matrix.shape
    matrix = matrix.astype(jnp.float32)
    # Ship the mask as int8 (1 B/elem).  Callers should ideally store it as
    # int8 end-to-end; bool->int8 here is a cheap byte-wise convert.
    if mask.dtype != jnp.int8:
        mask = mask.astype(jnp.int8)

    # Precompute 1/sigmoid(tau) once on the host side of the kernel.
    inv_sig = (1.0 / jax.nn.sigmoid(tau.astype(jnp.float32))).reshape((1,))

    # ~2 MiB per f32 operand block => double-buffered total well under 16 MiB.
    per_operand_budget = 2 << 20
    mt = _choose_m_tile(N, M, 4, per_operand_budget)
    m_steps = M // mt
    tb = _choose_b_tile(B, N, mt, 4, per_operand_budget, m_steps)

    grid = (B // tb, m_steps)
    blk = pl.BlockSpec((tb, N, mt), lambda b, m: (b, 0, m))

    return pl.pallas_call(
        _matching_norm_kernel,
        out_shape=jax.ShapeDtypeStruct((B, N, M), jnp.float32),
        grid_spec=pltpu.PrefetchScalarGridSpec(
            num_scalar_prefetch=0,
            grid=grid,
            in_specs=[
                pl.BlockSpec(memory_space=pltpu.SMEM),  # 1/sigmoid(tau), scalar
                blk,                                    # matrix (f32)
                blk,                                    # mask (int8)
            ],
            out_specs=blk,
        ),
        compiler_params=pltpu.CompilerParams(
            dimension_semantics=("parallel", "parallel"),
            vmem_limit_bytes=32 * 1024 * 1024,
        ),
    )(inv_sig, matrix, mask)


def _reference(matrix, mask, tau):
    mask_f = mask.astype(jnp.float32)
    mm = matrix * mask_f
    mm = mm / jax.nn.sigmoid(tau[0])
    mm = mm + (-1.0e9) * (1.0 - mask_f)
    return jax.nn.softmax(mm, axis=1)


if __name__ == "__main__":
    key = jax.random.PRNGKey(0)
    k1, k2 = jax.random.split(key)

    B, N, M = 2, 8, 16
    matrix = jax.random.normal(k1, (B, N, M), dtype=jnp.float32)
    mask = jax.random.bernoulli(k2, p=0.7, shape=(B, N, M))
    # guarantee at least one valid entry per softmax column (avoid all -1e9)
    mask = mask.at[:, 0, :].set(True)

    # nn.init.constant_(self.tau, 0) -> tau = 0.0 (deterministic parameter init)
    tau = jnp.zeros((1,), dtype=jnp.float32)

    out = matching_matrix_normalization(matrix, mask, tau)
    out = jax.block_until_ready(out)

    ref = _reference(matrix, mask, tau)
    assert out.shape == (B, N, M) and out.dtype == jnp.float32
    assert jnp.allclose(out, ref, atol=1e-5, rtol=1e-5)

    print("KERNEL_OK")
</pallas_src>

<mosaic_0001>
module attributes {stable_mosaic.version = 11 : i64} {
  func.func @_matching_norm_kernel(%arg0: i32, %arg1: i32, %arg2: memref<1xf32, #tpu.memory_space<smem>>, %arg3: memref<1x8x16xf32, #tpu.memory_space<vmem>>, %arg4: memref<1x8x16xi8, #tpu.memory_space<vmem>>, %arg5: memref<1x8x16xf32, #tpu.memory_space<vmem>>) attributes {dimension_semantics = [#tpu.dimension_semantics<parallel>, #tpu.dimension_semantics<parallel>], iteration_bounds = array<i64: 2, 1>, scalar_prefetch = 0 : i64, scratch_operands = 0 : i64, tpu.core_type = #tpu.core_type<tc>, window_params = [{transform_indices = @transform_0, window_bounds = array<i64: 1>}, {transform_indices = @transform_1, window_bounds = array<i64: 1, 8, 16>}, {transform_indices = @transform_2, window_bounds = array<i64: 1, 8, 16>}, {transform_indices = @transform_3, window_bounds = array<i64: 1, 8, 16>}]} {
    %c0 = arith.constant 0 : index
    %0 = memref.load %arg2[%c0] : memref<1xf32, #tpu.memory_space<smem>>
    %c0_0 = arith.constant 0 : index
    %c0_1 = arith.constant 0 : index
    %c0_2 = arith.constant 0 : index
    %1 = vector.load %arg4[%c0_0, %c0_1, %c0_2] : memref<1x8x16xi8, #tpu.memory_space<vmem>>, vector<1x8x16xi8>
    %c0_i8 = arith.constant 0 : i8
    %2 = vector.broadcast %c0_i8 : i8 to vector<1x8x16xi8>
    %3 = arith.cmpi ne, %1, %2 : vector<1x8x16xi8>
    %c0_3 = arith.constant 0 : index
    %c0_4 = arith.constant 0 : index
    %c0_5 = arith.constant 0 : index
    %4 = vector.load %arg3[%c0_3, %c0_4, %c0_5] : memref<1x8x16xf32, #tpu.memory_space<vmem>>, vector<1x8x16xf32>
    %5 = vector.broadcast %0 : f32 to vector<1x8x16xf32>
    %6 = arith.mulf %4, %5 : vector<1x8x16xf32>
    %cst = arith.constant -1.000000e+09 : f32
    %7 = vector.broadcast %cst : f32 to vector<1x8x16xf32>
    %8 = arith.select %3, %6, %7 : vector<1x8x16xi1>, vector<1x8x16xf32>
    %cst_6 = arith.constant dense<0xFF800000> : vector<1x16xf32>
    %9 = vector.multi_reduction <maximumf>, %8, %cst_6 [1] : vector<1x8x16xf32> to vector<1x16xf32>
    %10 = vector.shape_cast %9 : vector<1x16xf32> to vector<1x1x16xf32>
    %11 = vector.broadcast %10 : vector<1x1x16xf32> to vector<1x8x16xf32>
    %12 = arith.subf %8, %11 : vector<1x8x16xf32>
    %13 = math.exp %12 : vector<1x8x16xf32>
    %cst_7 = arith.constant dense<0.000000e+00> : vector<1x16xf32>
    %14 = vector.multi_reduction <add>, %13, %cst_7 [1] : vector<1x8x16xf32> to vector<1x16xf32>
    %15 = vector.shape_cast %14 : vector<1x16xf32> to vector<1x1x16xf32>
    %16 = tpu.reciprocal %15 : vector<1x1x16xf32> -> vector<1x1x16xf32>
    %17 = vector.broadcast %16 : vector<1x1x16xf32> to vector<1x8x16xf32>
    %18 = arith.mulf %13, %17 : vector<1x8x16xf32>
    %c0_8 = arith.constant 0 : index
    %c0_9 = arith.constant 0 : index
    %c0_10 = arith.constant 0 : index
    %19 = vector.load %arg5[%c0_8, %c0_9, %c0_10] : memref<1x8x16xf32, #tpu.memory_space<vmem>>, vector<1x8x16xf32>
    tpu.vector_store %arg5[%c0_8, %c0_9, %c0_10], %18 {strides = array<i32>} : memref<1x8x16xf32, #tpu.memory_space<vmem>>, vector<1x8x16xf32>,
    return
  }
  func.func @transform_0(%arg0: i32, %arg1: i32) -> i32 {
    %c0_i32 = arith.constant 0 : i32
    %c0_i32_0 = arith.constant 0 : i32
    return %c0_i32 : i32
  }
  func.func @transform_1(%arg0: i32, %arg1: i32) -> (i32, i32, i32) {
    %c0_i32 = arith.constant 0 : i32
    %c0_i32_0 = arith.constant 0 : i32
    return %arg0, %c0_i32, %arg1 : i32, i32, i32
  }
  func.func @transform_2(%arg0: i32, %arg1: i32) -> (i32, i32, i32) {
    %c0_i32 = arith.constant 0 : i32
    %c0_i32_0 = arith.constant 0 : i32
    return %arg0, %c0_i32, %arg1 : i32, i32, i32
  }
  func.func @transform_3(%arg0: i32, %arg1: i32) -> (i32, i32, i32) {
    %c0_i32 = arith.constant 0 : i32
    %c0_i32_0 = arith.constant 0 : i32
    return %arg0, %c0_i32, %arg1 : i32, i32, i32
  }
}

</mosaic_0001>

<bundles_post_ra>
// kernel: tpu_custom_call.1
= control target key start
LH: loop header
LB: loop body
LE: loop exit
PB: predicated region body
PF: predicated region fallthrough
CT: control target
= control target key end

     0   :  { %s820_s0 = inlined_call_operand.<no memory space> [shape: f32[1], index: 0, kind: input, shape index: {}]   ;;  %s821_s1 = inlined_call_operand.hbm [shape: f32[2,8,16], index: 1, kind: input, shape index: {}]   ;;  %s822_s2 = inlined_call_operand.hbm [shape: s8[2,8,16], index: 2, kind: input, shape index: {}]   ;;  %s823_s3 = inlined_call_operand.hbm [shape: f32[2,8,16], index: 3, kind: output, shape index: {}]  }
   0x1   :  { %8 = sst [smem:[#allocation2]] %s820_s0 }
   0x2   :  { %9 = vsyncpa [#allocation4], 0 }
   0x3   :  { %11 = vsyncpa [#allocation4 + $0x1], 0 }
   0x4   :  { %12 = vsyncpa [#allocation7], 0 }
   0x5   :  { %14 = vsyncpa [#allocation7 + $0x1], 0 }
   0x6   :  { %15 = vsyncpa [#allocation5], 0 }
   0x7   :  { %17 = vsyncpa [#allocation5 + $0x1], 0  ;;  %s675_s14 = smov 0   ;;  %s677_s15 = smov 0  }
   0x8   :  { %s679_s16 = smov 0   ;;  %s681_s17 = smov 0  }
   0x9   :  { %s683_s18 = smov 0   ;;  %s685_s19 = smov 0  }
   0xa LB: > { %s415_s0 = sadd.s32 4294967295, %s649_s19   ;;  %s416_s20 = sadd.s32 4294967294, %s649_s19   ;;  %s649_s19 = sphi %s685_s19, %s23_s19   ;;  %s645_s18 = sphi %s683_s18, %s833_s18   ;;  %s641_s17 = sphi %s681_s17, %s832_s17   ;;  %s637_s16 = sphi %s679_s16, %s831_s16   ;;  %s633_s15 = sphi %s677_s15, %s830_s15   ;;  %s629_s14 = sphi %s675_s14, %s829_s14  }
   0xb   : > { %s35_s21 = sadd.s32 1, %s645_s18  ;;  %s65_s22 = sadd.s32 1, %s637_s16 }
   0xc   : > { %p37_p0 = scmp.ge.s32.totalorder %s35_s21, 2  ;;  %p72_p1 = scmp.ne.s32.totalorder %s637_s16, %s633_s15 }
   0xd   : > { %p73_p2 = scmp.eq.s32.totalorder %s649_s19, 0  ;;  %p78_p3 = scmp.ne.s32.totalorder %s633_s15, %s629_s14 }
   0xe   : > { %s835_s21 = smov (%p37_p0, %s35_s21), 0  ;;  %p79_p5 = scmp.eq.s32.totalorder %s415_s0, 0 }
   0xf   : > { %p716_p4 = por %p73_p2, %p72_p1  ;;  %s60_s24 = ssub.s32 %s645_s18, %s835_s21 }
  0x10   : > { %p132_p6 = scmp.eq.s32.totalorder %s415_s0, 1  ;;  %p63_p7 = scmp.eq.s32.totalorder %s60_s24, 0 }
  0x11   : > { %p722_p8 = por %p79_p5, %p78_p3  ;;  %p138_p10 = scmp.eq.s32.totalorder %s416_s20, 1 }
  0x12   : > { %p726_p9 = por %p132_p6, %p72_p1  ;;  %p418_p12 = scmp.ge.s32.totalorder %s649_s19, 2 }
  0x13   : > { %s731_s27 = scalar_select %p63_p7, %s637_s16, %s65_s22  }
  0x14   : > { %p733_p11 = por %p138_p10, %p78_p3  ;;  %p448_p13 = scmp.lt.s32.totalorder %s649_s19, 2 }
  0x15   : > { %s161_s29 = sand.u32 1, %s637_s16   ;;  %s420_s4 = sshll.u32 %s645_s18, 3 }
  0x16   : > { %s419_s30 = sshll.u32 %s161_s29, 3  ;;  %s170_s7 = scalar_lea.hbm %s821_s1, %s420_s4 }
  0x17   : > { %s165_s8 = scalar_lea.vmem [#allocation3], %s419_s30  ;;  %s172_s10 = sshll.u32 %s170_s7, 4  ;;  %s173_s10 = int_to_ptr.hbm [resolvable:$true] %s172_s10 }
  0x18   : > { %s174_s9 = sshll.u32 %s165_s8, 4  ;;  %p746_p0 = pnand %p448_p13, %p716_p4  ;;  %s175_s9 = int_to_ptr.vmem [resolvable:$true] %s174_s9 }
  0x19   : > { %p423_p1 = scmp.ge.s32.totalorder %s649_s19, 1  ;;  %p199_p2 = scmp.lt.s32.totalorder %s649_s19, 3 }
  0x1a   : > { %s162_s12 = scalar_lea.sflag [#allocation4], %s161_s29  ;;  %s421_s13 = sshll.u32 %s161_s29, 1 }
  0x1b   : > { %440 = dma.hbm_to_vmem [thread:$0]  (!%p746_p0), %s173_s10, 128, %s175_s9, %s162_s12  }
  0x1c   : > { %p200_p3 = pnand %p423_p1, %p199_p2  ;;  %s422_s0 = sshll.u32 %s645_s18, 1 }
  0x1d   : > { %s190_s24 = scalar_lea.hbm %s822_s2, %s422_s0  ;;  %s185_s30 = scalar_lea.vmem [#allocation6], %s421_s13 }
  0x1e   : > { %s194_s23 = sshll.u32 %s185_s30, 4  ;;  %s192_s4 = sshll.u32 %s190_s24, 4  ;;  %s195_s23 = int_to_ptr.vmem [resolvable:$true] %s194_s23  ;;  %s193_s4 = int_to_ptr.hbm [resolvable:$true] %s192_s4 }
  0x1f   : > { %s182_s5 = scalar_lea.sflag [#allocation7], %s161_s29  ;;  %203 = sbr.rel (%p200_p3) target bundleno = 109 (0x6d), region = 32 }
  0x20   : > { %443 = dma.hbm_to_vmem [thread:$0]  (!%p746_p0), %s193_s4, 32, %s195_s23, %s182_s5  }
  0x21   : > { %s761_s6 = sand.u32 (!%p200_p3), 1, %s633_s15  }
  0x22   : > { %s424_s7 = sshll.u32 (!%p200_p3), %s761_s6, 3  ;;  %s206_s8 = scalar_lea.sflag (!%p200_p3), [#allocation4], %s761_s6 }
  0x23   : > { %s209_s9 = scalar_lea.vmem (!%p200_p3), [#allocation3], %s424_s7 }
  0x24   : > { %616 = dma.done.wait (%p722_p8), %s206_s8, 128  }
  0x25   : > { %618 = vsyncadd (%p722_p8), %s206_s8, 4294967168  ;;  %s425_s29 = sshll.u32 %s761_s6, 1  ;;  %s216_s10 = scalar_lea.sflag [#allocation7], %s761_s6 }
  0x26   : > { %s219_s11 = scalar_lea.vmem [#allocation6], %s425_s29 }
  0x27   : > { %620 = dma.done.wait (%p722_p8), %s216_s10, 32  }
  0x28   : > { %622 = vsyncadd (%p722_p8), %s216_s10, 4294967264  ;;  %s250_s12 = sld [smem:[#allocation2]]  ;;  %v253_v0 = vld [vmem:[%s209_s9] sm:$0xff]  ;;  %v251_v2 = vld [vmem:[%s219_s11] sm:$0x3]  ;;  %v651_v4 = vmov 0  }
  0x29   : > { %vm252_vm0 = vnez %v251_v2  ;;  %vm260_vm1 = vcmask 130048   ;;  %s428_s25 = sshll.u32 %s641_s17, 3  ;;  %s247_s22 = scalar_lea.vmem [#allocation8], %s424_s7 }
  0x2a   : > { %v256_v5 = vsel %vm252_vm0, 16843009, %v651_v4  ;;  %s306_s20 = scalar_lea.hbm %s823_s3, %s428_s25  ;;  %s308_s24 = sshll.u32 %s247_s22, 4  ;;  %s309_s24 = int_to_ptr.vmem [resolvable:$true] %s308_s24 }
  0x2b   : > { %v257_v6 = vunpack.c.0.s8 %v256_v5  ;;  %s310_s30 = sshll.u32 %s306_s20, 4  ;;  %s295_s17 = scalar_lea.sflag [#allocation5], %s761_s6  ;;  %s311_s30 = int_to_ptr.hbm [resolvable:$true] %s310_s30 }
  0x2c   : > { %s577_s23 = sshra.s32 %s311_s30, 4  ;;  %s583_s7 = scalar_lea.hbm %s823_s3, 16  ;;  %s578_s23 = int_to_ptr.hbm [resolvable:$true] %s577_s23 }
  0x2d   : > { %vm258_vm2 = vcmp.ne.s32.totalorder %v257_v6, 0  ;;  %s579_s4 = scalar_lea.hbm %s578_s23, 8  ;;  %p584_p7 = scmp.lt.s32.totalorder %s578_s23, %s823_s3 }
  0x2e   : > { %v254_v1 = vstv %s250_s12  ;;  %p580_p4 = scmp.ne.s32.totalorder %s578_s23, %s579_s4  ;;  %p585_p8 = scmp.lt.s32.totalorder %s583_s7, %s579_s4 }
  0x2f   : > { %v255_v3 = vmul.f32 %v254_v1, %v253_v0 }
  0x30   : > { %p581_p5 = pnand %p580_p4, %p726_p9  ;;  %p586_p10 = por %p585_p8, %p584_p7 }
  0x31   : > { %v259_v7 = vsel %vm258_vm2, %v255_v3, -1e+09 }
  0x32   : > { %v261_v8 = vsel %vm260_vm1, %v259_v7, -inf  ;;  %p582_p6 = pneg %p581_p5 }
  0x33   : > { %v262_v9 = vrot.slane %v261_v8, 4 }
  0x34   : > { %p587_p13 = pnand %p586_p10, %p582_p6 }
  0x35   : > { %v263_v10 = vmax.f32 %v261_v8, %v262_v9 }
  0x37   : > { %v264_v11 = vrot.slane %v263_v10, 2 }
  0x39   : > { %v265_v12 = vmax.f32 %v263_v10, %v264_v11 }
  0x3b   : > { %v266_v13 = vrot.slane %v265_v12, 1 }
  0x3d   : > { %v267_v14 = vmax.f32 %v265_v12, %v266_v13 }
  0x3f   : > { %v268_v15 = vsub.f32 %v259_v7, %v267_v14 }
  0x41   : > { %v269_v16 = vmul.f32 1.442695, %v268_v15 }
  0x43   : > { %499 = vpow2.f32 %v269_v16 }
  0x49   : > { %v500_v17 = vpop.eup %499 }
  0x4a   : > { %v271_v18 = vsel %vm260_vm1, %v500_v17, 0.0 }
  0x4b   : > { %v272_v19 = vrot.slane %v271_v18, 4 }
  0x4d   : > { %v273_v20 = vadd.f32 %v272_v19, %v271_v18 }
  0x4f   : > { %v274_v21 = vrot.slane %v273_v20, 2 }
  0x51   : > { %v275_v22 = vadd.f32 %v274_v21, %v273_v20 }
  0x53   : > { %v276_v23 = vrot.slane %v275_v22, 1 }
  0x55   : > { %v277_v24 = vadd.f32 %v276_v23, %v275_v22 }
  0x57   : > { %501 = vrcp.f32 %v277_v24  ;;  %v289_v27 = vand.u32 2147483648, %v277_v24  ;;  %vm283_vm3 = vweird.f32 %v277_v24  ;;  %v287_v29 = vand.u32 2147483647, %v277_v24 }
  0x59   : > { %v290_v31 = vor.u32 1.1754944e-38, %v289_v27  ;;  %vm288_vm6 = vcmp.eq.f32.partialorder %v287_v29, 8.507059e+37 }
  0x5d   : > { %v502_v25 = vpop.eup %501 }
  0x5e   : > { %v279_v26 = vmul.f32 %v502_v25, %v277_v24  ;;  %vm284_vm4 = vweird.f32 %v502_v25 }
  0x5f   : > { %vm285_vm5 = vmor %vm283_vm3, %vm284_vm4 }
  0x60   : > { %v280_v28 = vsub.f32 1.0, %v279_v26 }
  0x62   : > { %v281_v30 = vmul.f32 %v502_v25, %v280_v28 }
  0x64   : > { %v282_v32 = vadd.f32 %v502_v25, %v281_v30 }
  0x66   : > { %v286_v33 = vsel %vm285_vm5, %v502_v25, %v282_v32 }
  0x67   : > { %v291_v34 = vsel %vm288_vm6, %v290_v31, %v286_v33 }
  0x68   : > { %v292_v35 = vmul.f32 %v500_v17, %v291_v34 }
  0x6a   : > { %293 = vst.msk [vmem:[%s247_s22] sm:$0xff] %vm260_vm1, %v292_v35 }
  0x6b   : > { %590 = shalt.err (!%p587_p13)
}
  0x6c   : > { %435 = dma.vmem_to_hbm [thread:$0]  (%p726_p9), %s309_s24, 128, %s311_s30, %s295_s17  }
  0x6d PF: > { %s322_s6 = sand.u32 1, %s629_s14   ;;  %p445_p0 = pnand %p418_p12, %p733_p11 }
  0x6e   : > { %s323_s10 = scalar_lea.sflag [#allocation5], %s322_s6 }
  0x6f   : > { %p446_p1 = pneg %p445_p0 }
  0x71   : > { %624 = dma.done.wait (%p446_p1), %s323_s10, 128  }
  0x72   : > { %626 = vsyncadd (%p446_p1), %s323_s10, 4294967168  ;;  %s23_s19 = sadd.s32 1, %s649_s19   ;;  %s829_s14 = smov %s633_s15 }
  0x73   : > { %p20_p2 = scmp.ge.s32.totalorder %s23_s19, 4   ;;  %s830_s15 = smov %s637_s16 }
  0x74   : > { %s831_s16 = smov %s731_s27  ;;  %s832_s17 = smov %s645_s18 }
  0x75   : > { %s833_s18 = smov %s835_s21  ;;  %22 = sbr.rel (!%p20_p2) target bundleno = 10 (0xa), region = 90 }
  0x7a   :  { %329 = vsyncpa [#allocation4], 1 }
  0x7b   :  { %331 = vsyncpa [#allocation4 + $0x1], 1 }
  0x7c   :  { %332 = vsyncpa [#allocation7], 1 }
  0x7d   :  { %334 = vsyncpa [#allocation7 + $0x1], 1 }
  0x7e   :  { %335 = vsyncpa [#allocation5], 1 }
  0x7f   :  { %337 = vsyncpa [#allocation5 + $0x1], 1 }

</bundles_post_ra>
